<compile_context>
chip_gen: v7x
topology: tpu7x:2x2x1
jax: 0.10.0
libtpu: 0.0.40
codegen_flags: <defaults>
</compile_context>

<pallas_src>
import functools
import math

import jax
import jax.numpy as jnp
from jax import lax
from jax.experimental import pallas as pl
from jax.experimental.pallas import tpu as pltpu


# ------------------------------- fused kernel ------------------------------- #

def _fused_dwsep_kernel(x_ref, wdw_ref, t1_ref, wpw_ref, s2_ref, t2_ref, o_ref, *,
                        k, stride, th, rsub, wo, cin, wph):
    """One (batch, row-tile) grid step, channel-major.

    x_ref:   (Cin, Hph, s*s*Wph)  zero-padded (+ phase-split for stride 2) image
    wdw_ref: (k*k, Cin, 1, Wo)    depthwise taps pre-scaled by BN1 scale (f32)
    t1_ref:  (Cin, 1, Wo)         BN1 shift (f32)
    wpw_ref: (Cout, Cin)          pointwise weight (bf16 on the perf path)
    s2_ref:  (Cout, 1)            BN2 scale (f32)
    t2_ref:  (Cout, 1)            BN2 shift (f32)
    o_ref:   (Cout, TH*Wo)        lane-dense output block (already NCHW-flat)
    """
    s = stride
    row0 = pl.program_id(1) * th
    n_sub = th // rsub

    # Row sub-chunks: depthwise -> +shift/ReLU -> cast -> MXU matmul -> BN2 -> store,
    # all on one chunk before moving on (small f32 accumulator working set, MXU fed
    # straight from the just-produced activations).
    for j in range(n_sub):
        acc = jnp.zeros((cin, rsub, wo), jnp.float32)
        for dy in range(k):
            for dx in range(k):
                ph = (dy % s) * s + (dx % s)          # spatial phase -> dense slice
                win = x_ref[:,
                            pl.ds(row0 + j * rsub + dy // s, rsub),
                            pl.ds(ph * wph + dx // s, wo)]
                acc = acc + win.astype(jnp.float32) * wdw_ref[dy * k + dx]

        a = jnp.maximum(acc + t1_ref[...], 0.0)       # BN1 shift + ReLU (scale folded)
        # (Cin, rsub*Wo): free relabel when Wo % 128 == 0, otherwise a small relayout.
        a2 = a.reshape(cin, rsub * wo).astype(wpw_ref.dtype)
        y = jnp.dot(wpw_ref[...], a2, preferred_element_type=jnp.float32)  # MXU
        y = y * s2_ref[...] + t2_ref[...]             # BN2
        o_ref[:, pl.ds(j * rsub * wo, rsub * wo)] = y.astype(o_ref.dtype)


# ------------------------------- tiling helpers ------------------------------ #

def _pick_row_tile(ho, wo, *, max_tile_elems=4096):
    """Rows per output tile.  Guarantees a legal, lane-dense out block:
    (TH*Wo) % 128 == 0, or a single full-extent tile per batch element."""
    g = 128 // math.gcd(wo, 128)            # smallest TH with (TH*Wo) % 128 == 0
    if g >= ho or g * wo > max_tile_elems:
        return ho                           # single tile (block == full flat extent)
    th = g
    while th * 2 * wo <= max_tile_elems and th * 4 <= ho:
        th *= 2
    # prefer exact division of Ho (no padded garbage rows) when it stays lane-dense
    if ho % th and (th // 2) % g == 0 and ho % (th // 2) == 0:
        th //= 2
    return th


def _pick_sub_rows(th, wo, cin):
    """Rows per in-kernel sub-chunk (depthwise+ReLU+matmul+store granule)."""
    g = 128 // math.gcd(wo, 128)
    if th % g:                              # ragged single-tile fallback: one chunk
        return th
    r = g
    while th % (2 * r) == 0 and (r * wo < 512 or cin * r * wo * 4 < 16 * 1024):
        r *= 2
    return r


# ---------------------------------- wrapper ---------------------------------- #

@functools.partial(jax.jit,
                   static_argnames=("stride", "k", "eps", "img_dtype", "pw_dtype"))
def depthwise_separable_conv(x_nchw, params, *, stride=1, k=3, eps=1e-10,
                             img_dtype=jnp.bfloat16, pw_dtype=jnp.bfloat16):
    """Forward pass of DepthwiseSeparableConv. Input/output are NCHW float32."""
    assert stride in (1, 2)
    w_dw = params["w_dw"]            # (Cin, 1, k, k)   PyTorch OIHW, groups=Cin
    w_pw = params["w_pw"]            # (Cout, Cin, 1, 1)
    g1, b1, m1, v1 = params["bn1"]   # each (Cin,)
    g2, b2, m2, v2 = params["bn2"]   # each (Cout,)

    N, Cin, H, W = x_nchw.shape
    Cout = w_pw.shape[0]
    pad = k // 2
    s = stride
    Ho = (H + 2 * pad - k) // s + 1
    Wo = (W + 2 * pad - k) // s + 1

    TH = _pick_row_tile(Ho, Wo)
    RS = _pick_sub_rows(TH, Wo, Cin)
    Ho_pad = -(-Ho // TH) * TH
    n_rt = Ho_pad // TH

    hph = Ho_pad + (k - 1) // s          # per-phase padded height the kernel reads
    wph = Wo + (k - 1) // s              # per-phase padded width
    Hp, Wp = s * hph, s * wph            # pre-phase-split padded extents
    bot, rgt = Hp - H - pad, Wp - W - pad
    assert bot >= 0 and rgt >= 0

    # ---- host/XLA prep: one fused pad(+phase-split)+cast pass, no transpose ---- #
    xp = jnp.pad(x_nchw.astype(img_dtype), ((0, 0), (0, 0), (pad, bot), (pad, rgt)))
    if s == 1:
        x_ph = xp                                                    # (N,Cin,hph,wph)
    else:
        # space-to-depth phase split: every strided tap becomes a dense slice
        x_ph = xp.reshape(N, Cin, hph, s, wph, s)
        x_ph = jnp.transpose(x_ph, (0, 1, 2, 3, 5, 4)).reshape(N, Cin, hph, s * s * wph)

    # fold eval-mode BN into per-channel affine; fold BN1 scale into the dw taps
    s1 = g1 / jnp.sqrt(v1 + eps)
    t1 = b1 - m1 * s1
    s2 = g2 / jnp.sqrt(v2 + eps)
    t2 = b2 - m2 * s2

    w_taps = (w_dw[:, 0, :, :] * s1[:, None, None]).reshape(Cin, k * k).T   # (k*k,Cin)
    w_taps = jnp.broadcast_to(w_taps[:, :, None, None].astype(jnp.float32),
                              (k * k, Cin, 1, Wo))
    t1_b = jnp.broadcast_to(t1[:, None, None].astype(jnp.float32), (Cin, 1, Wo))
    wpw = w_pw[:, :, 0, 0].astype(pw_dtype)                                 # (Cout,Cin)
    s2_b = s2.reshape(Cout, 1).astype(jnp.float32)
    t2_b = t2.reshape(Cout, 1).astype(jnp.float32)

    kern = functools.partial(_fused_dwsep_kernel, k=k, stride=s, th=TH, rsub=RS,
                             wo=Wo, cin=Cin, wph=wph)

    img_block_bytes = Cin * hph * (s * s * wph) * jnp.dtype(img_dtype).itemsize
    out_block_bytes = Cout * TH * Wo * 4
    vmem_limit = int(min(max(2 * img_block_bytes + 2 * out_block_bytes + (12 << 20),
                             32 << 20), 56 << 20))   # < v7x physical 64 MiB

    out_flat = pl.pallas_call(
        kern,
        out_shape=jax.ShapeDtypeStruct((N, Cout, Ho_pad * Wo), jnp.float32),
        grid_spec=pltpu.PrefetchScalarGridSpec(
            num_scalar_prefetch=0,
            grid=(N, n_rt),
            in_specs=[
                # padded image: resident per batch element (index ignores row axis)
                pl.BlockSpec((None, Cin, hph, s * s * wph), lambda b, r: (b, 0, 0, 0)),
                pl.BlockSpec((k * k, Cin, 1, Wo), lambda b, r: (0, 0, 0, 0)),
                pl.BlockSpec((Cin, 1, Wo), lambda b, r: (0, 0, 0)),
                pl.BlockSpec((Cout, Cin), lambda b, r: (0, 0)),
                pl.BlockSpec((Cout, 1), lambda b, r: (0, 0)),
                pl.BlockSpec((Cout, 1), lambda b, r: (0, 0)),
            ],
            out_specs=pl.BlockSpec((None, Cout, TH * Wo), lambda b, r: (b, 0, r)),
        ),
        compiler_params=pltpu.CompilerParams(
            # row axis "arbitrary": megacore shards over batch, so the two v7x cores
            # never hold duplicate copies of the same per-batch image in VMEM
            dimension_semantics=("parallel", "arbitrary"),
            vmem_limit_bytes=vmem_limit,
        ),
    )(x_ph, w_taps, t1_b, wpw, s2_b, t2_b)

    out = out_flat.reshape(N, Cout, Ho_pad, Wo)      # already NCHW — no transpose pass
    if Ho_pad != Ho:
        out = out[:, :, :Ho, :]
    return out


# ----------------------------- pure-JAX reference ---------------------------- #

def _bn_ref(y_nchw, g, b, m, v, eps):
    inv = g / jnp.sqrt(v + eps)
    return y_nchw * inv[None, :, None, None] + (b - m * inv)[None, :, None, None]


def reference(x_nchw, params, *, stride=1, k=3, eps=1e-10, pw_dtype=jnp.float32):
    """Reference; pw_dtype mirrors the kernel's pointwise matmul input precision."""
    Cin = x_nchw.shape[1]
    pad = k // 2
    g1, b1, m1, v1 = params["bn1"]
    g2, b2, m2, v2 = params["bn2"]
    y = lax.conv_general_dilated(
        x_nchw.astype(jnp.float32), params["w_dw"].astype(jnp.float32),
        (stride, stride), [(pad, pad), (pad, pad)],
        feature_group_count=Cin, dimension_numbers=("NCHW", "OIHW", "NCHW"),
        precision=lax.Precision.HIGHEST)
    y = jnp.maximum(_bn_ref(y, g1, b1, m1, v1, eps), 0.0)
    pw_prec = lax.Precision.HIGHEST if pw_dtype == jnp.float32 else lax.Precision.DEFAULT
    y = lax.conv_general_dilated(
        y.astype(pw_dtype), params["w_pw"].astype(pw_dtype),
        (1, 1), [(0, 0), (0, 0)],
        dimension_numbers=("NCHW", "OIHW", "NCHW"),
        preferred_element_type=jnp.float32, precision=pw_prec)
    return _bn_ref(y, g2, b2, m2, v2, eps)


# ------------------------------------ main ----------------------------------- #

if __name__ == "__main__":
    N, Cin, Cout, H, W, k = 2, 4, 8, 16, 16, 3

    key = jax.random.PRNGKey(0)
    ks = jax.random.split(key, 10)
    x = jax.random.normal(ks[0], (N, Cin, H, W), jnp.float32)

    params = {
        "w_dw": 0.3 * jax.random.normal(ks[1], (Cin, 1, k, k), jnp.float32),
        "w_pw": 0.3 * jax.random.normal(ks[2], (Cout, Cin, 1, 1), jnp.float32),
        "bn1": (1.0 + 0.1 * jax.random.normal(ks[3], (Cin,), jnp.float32),
                0.1 * jax.random.normal(ks[4], (Cin,), jnp.float32),
                0.1 * jax.random.normal(ks[5], (Cin,), jnp.float32),
                0.5 + jax.nn.softplus(jax.random.normal(ks[6], (Cin,), jnp.float32))),
        "bn2": (1.0 + 0.1 * jax.random.normal(ks[7], (Cout,), jnp.float32),
                0.1 * jax.random.normal(ks[8], (Cout,), jnp.float32),
                0.1 * jax.random.normal(ks[9], (Cout,), jnp.float32),
                0.5 + jax.nn.softplus(jax.random.normal(ks[6], (Cout,), jnp.float32))),
    }

    pad = k // 2
    for stride in (1, 2):
        Ho = (H + 2 * pad - k) // stride + 1
        Wo = (W + 2 * pad - k) // stride + 1

        # exact-parity path: f32 image + f32 pointwise vs. f32 HIGHEST reference
        out_f32 = jax.block_until_ready(
            depthwise_separable_conv(x, params, stride=stride, k=k,
                                     img_dtype=jnp.float32, pw_dtype=jnp.float32))
        assert out_f32.shape == (N, Cout, Ho, Wo), out_f32.shape
        ref_f32 = reference(x, params, stride=stride, k=k, pw_dtype=jnp.float32)
        err32 = float(jnp.max(jnp.abs(out_f32 - ref_f32)))
        assert jnp.allclose(out_f32, ref_f32, atol=1e-3, rtol=1e-3), (stride, "f32", err32)

        # perf path: bf16 image + bf16 pointwise vs. a precision-mirrored reference
        out_bf = jax.block_until_ready(
            depthwise_separable_conv(x, params, stride=stride, k=k))
        assert out_bf.shape == (N, Cout, Ho, Wo), out_bf.shape
        x_bf = x.astype(jnp.bfloat16).astype(jnp.float32)
        ref_bf = reference(x_bf, params, stride=stride, k=k, pw_dtype=jnp.bfloat16)
        errbf = float(jnp.max(jnp.abs(out_bf - ref_bf)))
        assert jnp.allclose(out_bf, ref_bf, atol=1e-2, rtol=1e-2), (stride, "bf16", errbf)

    print("KERNEL_OK")
</pallas_src>

<mosaic_0001>
module attributes {stable_mosaic.version = 11 : i64} {
  func.func @_fused_dwsep_kernel(%arg0: i32, %arg1: i32, %arg2: memref<1x4x18x18xf32, #tpu.memory_space<vmem>>, %arg3: memref<9x4x1x16xf32, #tpu.memory_space<vmem>>, %arg4: memref<4x1x16xf32, #tpu.memory_space<vmem>>, %arg5: memref<8x4xf32, #tpu.memory_space<vmem>>, %arg6: memref<8x1xf32, #tpu.memory_space<vmem>>, %arg7: memref<8x1xf32, #tpu.memory_space<vmem>>, %arg8: memref<1x8x128xf32, #tpu.memory_space<vmem>>) attributes {dimension_semantics = [#tpu.dimension_semantics<parallel>, #tpu.dimension_semantics<arbitrary>], iteration_bounds = array<i64: 2, 2>, scalar_prefetch = 0 : i64, scratch_operands = 0 : i64, tpu.core_type = #tpu.core_type<tc>, window_params = [{transform_indices = @transform_0, window_bounds = array<i64: 1, 4, 18, 18>}, {pipeline_mode = #tpu.pipeline_mode<synchronous>, transform_indices = @transform_1, window_bounds = array<i64: 9, 4, 1, 16>}, {pipeline_mode = #tpu.pipeline_mode<synchronous>, transform_indices = @transform_2, window_bounds = array<i64: 4, 1, 16>}, {pipeline_mode = #tpu.pipeline_mode<synchronous>, transform_indices = @transform_3, window_bounds = array<i64: 8, 4>}, {pipeline_mode = #tpu.pipeline_mode<synchronous>, transform_indices = @transform_4, window_bounds = array<i64: 8, 1>}, {pipeline_mode = #tpu.pipeline_mode<synchronous>, transform_indices = @transform_5, window_bounds = array<i64: 8, 1>}, {transform_indices = @transform_6, window_bounds = array<i64: 1, 8, 128>}]} {
    %c8_i32 = arith.constant 8 : i32
    %0 = arith.muli %arg1, %c8_i32 : i32
    %cst = arith.constant 0.000000e+00 : f32
    %1 = vector.broadcast %cst : f32 to vector<4x8x16xf32>
    %c0_i32 = arith.constant 0 : i32
    %2 = arith.addi %0, %c0_i32 : i32
    %c0_i32_0 = arith.constant 0 : i32
    %3 = arith.addi %2, %c0_i32_0 : i32
    %c0 = arith.constant 0 : index
    %c0_1 = arith.constant 0 : index
    %4 = arith.index_cast %3 : i32 to index
    %c0_2 = arith.constant 0 : index
    %5 = vector.load %arg2[%c0, %c0_1, %4, %c0_2] : memref<1x4x18x18xf32, #tpu.memory_space<vmem>>, vector<1x4x8x16xf32>
    %6 = vector.shape_cast %5 : vector<1x4x8x16xf32> to vector<4x8x16xf32>
    %c0_3 = arith.constant 0 : index
    %c0_4 = arith.constant 0 : index
    %c0_5 = arith.constant 0 : index
    %c0_6 = arith.constant 0 : index
    %7 = vector.load %arg3[%c0_3, %c0_4, %c0_5, %c0_6] : memref<9x4x1x16xf32, #tpu.memory_space<vmem>>, vector<1x4x1x16xf32>
    %8 = vector.shape_cast %7 : vector<1x4x1x16xf32> to vector<4x1x16xf32>
    %9 = vector.broadcast %8 : vector<4x1x16xf32> to vector<4x8x16xf32>
    %10 = arith.mulf %6, %9 : vector<4x8x16xf32>
    %11 = arith.addf %1, %10 : vector<4x8x16xf32>
    %c0_i32_7 = arith.constant 0 : i32
    %12 = arith.addi %0, %c0_i32_7 : i32
    %c0_i32_8 = arith.constant 0 : i32
    %13 = arith.addi %12, %c0_i32_8 : i32
    %c0_9 = arith.constant 0 : index
    %c0_10 = arith.constant 0 : index
    %14 = arith.index_cast %13 : i32 to index
    %c1 = arith.constant 1 : index
    %15 = vector.load %arg2[%c0_9, %c0_10, %14, %c1] : memref<1x4x18x18xf32, #tpu.memory_space<vmem>>, vector<1x4x8x16xf32>
    %16 = vector.shape_cast %15 : vector<1x4x8x16xf32> to vector<4x8x16xf32>
    %c1_11 = arith.constant 1 : index
    %c0_12 = arith.constant 0 : index
    %c0_13 = arith.constant 0 : index
    %c0_14 = arith.constant 0 : index
    %17 = vector.load %arg3[%c1_11, %c0_12, %c0_13, %c0_14] : memref<9x4x1x16xf32, #tpu.memory_space<vmem>>, vector<1x4x1x16xf32>
    %18 = vector.shape_cast %17 : vector<1x4x1x16xf32> to vector<4x1x16xf32>
    %19 = vector.broadcast %18 : vector<4x1x16xf32> to vector<4x8x16xf32>
    %20 = arith.mulf %16, %19 : vector<4x8x16xf32>
    %21 = arith.addf %11, %20 : vector<4x8x16xf32>
    %c0_i32_15 = arith.constant 0 : i32
    %22 = arith.addi %0, %c0_i32_15 : i32
    %c0_i32_16 = arith.constant 0 : i32
    %23 = arith.addi %22, %c0_i32_16 : i32
    %c0_17 = arith.constant 0 : index
    %c0_18 = arith.constant 0 : index
    %24 = arith.index_cast %23 : i32 to index
    %c2 = arith.constant 2 : index
    %25 = vector.load %arg2[%c0_17, %c0_18, %24, %c2] : memref<1x4x18x18xf32, #tpu.memory_space<vmem>>, vector<1x4x8x16xf32>
    %26 = vector.shape_cast %25 : vector<1x4x8x16xf32> to vector<4x8x16xf32>
    %c2_19 = arith.constant 2 : index
    %c0_20 = arith.constant 0 : index
    %c0_21 = arith.constant 0 : index
    %c0_22 = arith.constant 0 : index
    %27 = vector.load %arg3[%c2_19, %c0_20, %c0_21, %c0_22] : memref<9x4x1x16xf32, #tpu.memory_space<vmem>>, vector<1x4x1x16xf32>
    %28 = vector.shape_cast %27 : vector<1x4x1x16xf32> to vector<4x1x16xf32>
    %29 = vector.broadcast %28 : vector<4x1x16xf32> to vector<4x8x16xf32>
    %30 = arith.mulf %26, %29 : vector<4x8x16xf32>
    %31 = arith.addf %21, %30 : vector<4x8x16xf32>
    %c0_i32_23 = arith.constant 0 : i32
    %32 = arith.addi %0, %c0_i32_23 : i32
    %c1_i32 = arith.constant 1 : i32
    %33 = arith.addi %32, %c1_i32 : i32
    %c0_24 = arith.constant 0 : index
    %c0_25 = arith.constant 0 : index
    %34 = arith.index_cast %33 : i32 to index
    %c0_26 = arith.constant 0 : index
    %35 = vector.load %arg2[%c0_24, %c0_25, %34, %c0_26] : memref<1x4x18x18xf32, #tpu.memory_space<vmem>>, vector<1x4x8x16xf32>
    %36 = vector.shape_cast %35 : vector<1x4x8x16xf32> to vector<4x8x16xf32>
    %c3 = arith.constant 3 : index
    %c0_27 = arith.constant 0 : index
    %c0_28 = arith.constant 0 : index
    %c0_29 = arith.constant 0 : index
    %37 = vector.load %arg3[%c3, %c0_27, %c0_28, %c0_29] : memref<9x4x1x16xf32, #tpu.memory_space<vmem>>, vector<1x4x1x16xf32>
    %38 = vector.shape_cast %37 : vector<1x4x1x16xf32> to vector<4x1x16xf32>
    %39 = vector.broadcast %38 : vector<4x1x16xf32> to vector<4x8x16xf32>
    %40 = arith.mulf %36, %39 : vector<4x8x16xf32>
    %41 = arith.addf %31, %40 : vector<4x8x16xf32>
    %c0_i32_30 = arith.constant 0 : i32
    %42 = arith.addi %0, %c0_i32_30 : i32
    %c1_i32_31 = arith.constant 1 : i32
    %43 = arith.addi %42, %c1_i32_31 : i32
    %c0_32 = arith.constant 0 : index
    %c0_33 = arith.constant 0 : index
    %44 = arith.index_cast %43 : i32 to index
    %c1_34 = arith.constant 1 : index
    %45 = vector.load %arg2[%c0_32, %c0_33, %44, %c1_34] : memref<1x4x18x18xf32, #tpu.memory_space<vmem>>, vector<1x4x8x16xf32>
    %46 = vector.shape_cast %45 : vector<1x4x8x16xf32> to vector<4x8x16xf32>
    %c4 = arith.constant 4 : index
    %c0_35 = arith.constant 0 : index
    %c0_36 = arith.constant 0 : index
    %c0_37 = arith.constant 0 : index
    %47 = vector.load %arg3[%c4, %c0_35, %c0_36, %c0_37] : memref<9x4x1x16xf32, #tpu.memory_space<vmem>>, vector<1x4x1x16xf32>
    %48 = vector.shape_cast %47 : vector<1x4x1x16xf32> to vector<4x1x16xf32>
    %49 = vector.broadcast %48 : vector<4x1x16xf32> to vector<4x8x16xf32>
    %50 = arith.mulf %46, %49 : vector<4x8x16xf32>
    %51 = arith.addf %41, %50 : vector<4x8x16xf32>
    %c0_i32_38 = arith.constant 0 : i32
    %52 = arith.addi %0, %c0_i32_38 : i32
    %c1_i32_39 = arith.constant 1 : i32
    %53 = arith.addi %52, %c1_i32_39 : i32
    %c0_40 = arith.constant 0 : index
    %c0_41 = arith.constant 0 : index
    %54 = arith.index_cast %53 : i32 to index
    %c2_42 = arith.constant 2 : index
    %55 = vector.load %arg2[%c0_40, %c0_41, %54, %c2_42] : memref<1x4x18x18xf32, #tpu.memory_space<vmem>>, vector<1x4x8x16xf32>
    %56 = vector.shape_cast %55 : vector<1x4x8x16xf32> to vector<4x8x16xf32>
    %c5 = arith.constant 5 : index
    %c0_43 = arith.constant 0 : index
    %c0_44 = arith.constant 0 : index
    %c0_45 = arith.constant 0 : index
    %57 = vector.load %arg3[%c5, %c0_43, %c0_44, %c0_45] : memref<9x4x1x16xf32, #tpu.memory_space<vmem>>, vector<1x4x1x16xf32>
    %58 = vector.shape_cast %57 : vector<1x4x1x16xf32> to vector<4x1x16xf32>
    %59 = vector.broadcast %58 : vector<4x1x16xf32> to vector<4x8x16xf32>
    %60 = arith.mulf %56, %59 : vector<4x8x16xf32>
    %61 = arith.addf %51, %60 : vector<4x8x16xf32>
    %c0_i32_46 = arith.constant 0 : i32
    %62 = arith.addi %0, %c0_i32_46 : i32
    %c2_i32 = arith.constant 2 : i32
    %63 = arith.addi %62, %c2_i32 : i32
    %c0_47 = arith.constant 0 : index
    %c0_48 = arith.constant 0 : index
    %64 = arith.index_cast %63 : i32 to index
    %c0_49 = arith.constant 0 : index
    %65 = vector.load %arg2[%c0_47, %c0_48, %64, %c0_49] : memref<1x4x18x18xf32, #tpu.memory_space<vmem>>, vector<1x4x8x16xf32>
    %66 = vector.shape_cast %65 : vector<1x4x8x16xf32> to vector<4x8x16xf32>
    %c6 = arith.constant 6 : index
    %c0_50 = arith.constant 0 : index
    %c0_51 = arith.constant 0 : index
    %c0_52 = arith.constant 0 : index
    %67 = vector.load %arg3[%c6, %c0_50, %c0_51, %c0_52] : memref<9x4x1x16xf32, #tpu.memory_space<vmem>>, vector<1x4x1x16xf32>
    %68 = vector.shape_cast %67 : vector<1x4x1x16xf32> to vector<4x1x16xf32>
    %69 = vector.broadcast %68 : vector<4x1x16xf32> to vector<4x8x16xf32>
    %70 = arith.mulf %66, %69 : vector<4x8x16xf32>
    %71 = arith.addf %61, %70 : vector<4x8x16xf32>
    %c0_i32_53 = arith.constant 0 : i32
    %72 = arith.addi %0, %c0_i32_53 : i32
    %c2_i32_54 = arith.constant 2 : i32
    %73 = arith.addi %72, %c2_i32_54 : i32
    %c0_55 = arith.constant 0 : index
    %c0_56 = arith.constant 0 : index
    %74 = arith.index_cast %73 : i32 to index
    %c1_57 = arith.constant 1 : index
    %75 = vector.load %arg2[%c0_55, %c0_56, %74, %c1_57] : memref<1x4x18x18xf32, #tpu.memory_space<vmem>>, vector<1x4x8x16xf32>
    %76 = vector.shape_cast %75 : vector<1x4x8x16xf32> to vector<4x8x16xf32>
    %c7 = arith.constant 7 : index
    %c0_58 = arith.constant 0 : index
    %c0_59 = arith.constant 0 : index
    %c0_60 = arith.constant 0 : index
    %77 = vector.load %arg3[%c7, %c0_58, %c0_59, %c0_60] : memref<9x4x1x16xf32, #tpu.memory_space<vmem>>, vector<1x4x1x16xf32>
    %78 = vector.shape_cast %77 : vector<1x4x1x16xf32> to vector<4x1x16xf32>
    %79 = vector.broadcast %78 : vector<4x1x16xf32> to vector<4x8x16xf32>
    %80 = arith.mulf %76, %79 : vector<4x8x16xf32>
    %81 = arith.addf %71, %80 : vector<4x8x16xf32>
    %c0_i32_61 = arith.constant 0 : i32
    %82 = arith.addi %0, %c0_i32_61 : i32
    %c2_i32_62 = arith.constant 2 : i32
    %83 = arith.addi %82, %c2_i32_62 : i32
    %c0_63 = arith.constant 0 : index
    %c0_64 = arith.constant 0 : index
    %84 = arith.index_cast %83 : i32 to index
    %c2_65 = arith.constant 2 : index
    %85 = vector.load %arg2[%c0_63, %c0_64, %84, %c2_65] : memref<1x4x18x18xf32, #tpu.memory_space<vmem>>, vector<1x4x8x16xf32>
    %86 = vector.shape_cast %85 : vector<1x4x8x16xf32> to vector<4x8x16xf32>
    %c8 = arith.constant 8 : index
    %c0_66 = arith.constant 0 : index
    %c0_67 = arith.constant 0 : index
    %c0_68 = arith.constant 0 : index
    %87 = vector.load %arg3[%c8, %c0_66, %c0_67, %c0_68] : memref<9x4x1x16xf32, #tpu.memory_space<vmem>>, vector<1x4x1x16xf32>
    %88 = vector.shape_cast %87 : vector<1x4x1x16xf32> to vector<4x1x16xf32>
    %89 = vector.broadcast %88 : vector<4x1x16xf32> to vector<4x8x16xf32>
    %90 = arith.mulf %86, %89 : vector<4x8x16xf32>
    %91 = arith.addf %81, %90 : vector<4x8x16xf32>
    %c0_69 = arith.constant 0 : index
    %c0_70 = arith.constant 0 : index
    %c0_71 = arith.constant 0 : index
    %92 = vector.load %arg4[%c0_69, %c0_70, %c0_71] : memref<4x1x16xf32, #tpu.memory_space<vmem>>, vector<4x1x16xf32>
    %93 = vector.broadcast %92 : vector<4x1x16xf32> to vector<4x8x16xf32>
    %94 = arith.addf %91, %93 : vector<4x8x16xf32>
    %cst_72 = arith.constant 0.000000e+00 : f32
    %95 = vector.broadcast %cst_72 : f32 to vector<4x8x16xf32>
    %96 = arith.maximumf %94, %95 : vector<4x8x16xf32>
    %97 = vector.shape_cast %96 : vector<4x8x16xf32> to vector<4x128xf32>
    %c0_73 = arith.constant 0 : index
    %c0_74 = arith.constant 0 : index
    %98 = vector.load %arg5[%c0_73, %c0_74] : memref<8x4xf32, #tpu.memory_space<vmem>>, vector<8x4xf32>
    %cst_75 = arith.constant dense<0.000000e+00> : vector<8x128xf32>
    %99 = tpu.matmul %98, %97, %cst_75 {dimension_numbers = #tpu.dot_dimension_numbers<[1], [0], [0], [1], [0, 0, 1, 1], [], []>} : vector<8x4xf32>, vector<4x128xf32>, vector<8x128xf32> -> vector<8x128xf32>
    %c0_76 = arith.constant 0 : index
    %c0_77 = arith.constant 0 : index
    %100 = vector.load %arg6[%c0_76, %c0_77] : memref<8x1xf32, #tpu.memory_space<vmem>>, vector<8x1xf32>
    %101 = vector.broadcast %100 : vector<8x1xf32> to vector<8x128xf32>
    %102 = arith.mulf %99, %101 : vector<8x128xf32>
    %c0_78 = arith.constant 0 : index
    %c0_79 = arith.constant 0 : index
    %103 = vector.load %arg7[%c0_78, %c0_79] : memref<8x1xf32, #tpu.memory_space<vmem>>, vector<8x1xf32>
    %104 = vector.broadcast %103 : vector<8x1xf32> to vector<8x128xf32>
    %105 = arith.addf %102, %104 : vector<8x128xf32>
    %c0_80 = arith.constant 0 : index
    %c0_81 = arith.constant 0 : index
    %c0_82 = arith.constant 0 : index
    %106 = vector.load %arg8[%c0_80, %c0_81, %c0_82] : memref<1x8x128xf32, #tpu.memory_space<vmem>>, vector<1x8x128xf32>
    %107 = vector.shape_cast %106 : vector<1x8x128xf32> to vector<8x128xf32>
    %108 = vector.shape_cast %105 : vector<8x128xf32> to vector<1x8x128xf32>
    tpu.vector_store %arg8[%c0_80, %c0_81, %c0_82], %108 {strides = array<i32>} : memref<1x8x128xf32, #tpu.memory_space<vmem>>, vector<1x8x128xf32>,
    return
  }
  func.func @transform_0(%arg0: i32, %arg1: i32) -> (i32, i32, i32, i32) {
    %c0_i32 = arith.constant 0 : i32
    %c0_i32_0 = arith.constant 0 : i32
    %c0_i32_1 = arith.constant 0 : i32
    %c0_i32_2 = arith.constant 0 : i32
    return %arg0, %c0_i32, %c0_i32_0, %c0_i32_1 : i32, i32, i32, i32
  }
  func.func @transform_1(%arg0: i32, %arg1: i32) -> (i32, i32, i32, i32) {
    %c0_i32 = arith.constant 0 : i32
    %c0_i32_0 = arith.constant 0 : i32
    %c0_i32_1 = arith.constant 0 : i32
    %c0_i32_2 = arith.constant 0 : i32
    %c0_i32_3 = arith.constant 0 : i32
    return %c0_i32, %c0_i32_0, %c0_i32_1, %c0_i32_2 : i32, i32, i32, i32
  }
  func.func @transform_2(%arg0: i32, %arg1: i32) -> (i32, i32, i32) {
    %c0_i32 = arith.constant 0 : i32
    %c0_i32_0 = arith.constant 0 : i32
    %c0_i32_1 = arith.constant 0 : i32
    %c0_i32_2 = arith.constant 0 : i32
    return %c0_i32, %c0_i32_0, %c0_i32_1 : i32, i32, i32
  }
  func.func @transform_3(%arg0: i32, %arg1: i32) -> (i32, i32) {
    %c0_i32 = arith.constant 0 : i32
    %c0_i32_0 = arith.constant 0 : i32
    %c0_i32_1 = arith.constant 0 : i32
    return %c0_i32, %c0_i32_0 : i32, i32
  }
  func.func @transform_4(%arg0: i32, %arg1: i32) -> (i32, i32) {
    %c0_i32 = arith.constant 0 : i32
    %c0_i32_0 = arith.constant 0 : i32
    %c0_i32_1 = arith.constant 0 : i32
    return %c0_i32, %c0_i32_0 : i32, i32
  }
  func.func @transform_5(%arg0: i32, %arg1: i32) -> (i32, i32) {
    %c0_i32 = arith.constant 0 : i32
    %c0_i32_0 = arith.constant 0 : i32
    %c0_i32_1 = arith.constant 0 : i32
    return %c0_i32, %c0_i32_0 : i32, i32
  }
  func.func @transform_6(%arg0: i32, %arg1: i32) -> (i32, i32, i32) {
    %c0_i32 = arith.constant 0 : i32
    %c0_i32_0 = arith.constant 0 : i32
    return %arg0, %c0_i32, %arg1 : i32, i32, i32
  }
}

</mosaic_0001>

<bundles_post_ra>
// kernel: depthwise_separable_conv.1
= control target key start
LH: loop header
LB: loop body
LE: loop exit
PB: predicated region body
PF: predicated region fallthrough
CT: control target
= control target key end

     0   :  { %s1346_s21 = smov 0   ;;  %s1348_s22 = smov 0   ;;  %s1667_s0 = inlined_call_operand.vmem [shape: f32[2,4,18,18], index: 0, kind: input, shape index: {}]   ;;  %s1668_s1 = inlined_call_operand.vmem [shape: f32[9,4,1,16], index: 1, kind: input, shape index: {}]   ;;  %s1669_s2 = inlined_call_operand.vmem [shape: f32[4,1,16], index: 2, kind: input, shape index: {}]   ;;  %s1670_s3 = inlined_call_operand.vmem [shape: f32[8,4], index: 3, kind: input, shape index: {}]   ;;  %s1671_s4 = inlined_call_operand.vmem [shape: f32[8,1], index: 4, kind: input, shape index: {}]   ;;  %s1672_s5 = inlined_call_operand.vmem [shape: f32[8,1], index: 5, kind: input, shape index: {}]   ;;  %s1673_s6 = inlined_call_operand.vmem [shape: f32[2,8,256], index: 6, kind: output, shape index: {}]  }
   0x1   :  { %s1350_s23 = smov 0   ;;  %s1352_s24 = smov 0  }
   0x2   :  { %s1354_s25 = smov 0  }
   0x3 LB: > { %s25_s26 = sadd.s32 1, %s1285_s23  ;;  %s28_s27 = sadd.s32 1, %s1289_s24  ;;  %s1293_s25 = sphi %s1354_s25, %s16_s25   ;;  %s1289_s24 = sphi %s1352_s24, %s1677_s24   ;;  %s1285_s23 = sphi %s1350_s23, %s1676_s23   ;;  %s1281_s22 = sphi %s1348_s22, %s1675_s22   ;;  %s1277_s21 = sphi %s1346_s21, %s1674_s21  }
   0x4   : > { %p26_p0 = scmp.ge.s32.totalorder %s25_s26, 2  ;;  %p1098_p1 = scmp.ge.s32.totalorder %s1293_s25, 1 }
   0x5   : > { %p226_p2 = scmp.lt.s32.totalorder %s1293_s25, 5 }
   0x6   : > { %s1679_s26 = smov (%p26_p0, %s25_s26), 0  ;;  %s1681_s27 = smov (!%p26_p0, %s28_s27), %s1289_s24 }
   0x7   : > { %p227_p3 = pnand %p1098_p1, %p226_p2  ;;  %p30_p4 = scmp.ge.s32.totalorder %s1681_s27, 2 }
   0x8   : > { %v1111_v0 = vld [vmem:[%s1668_s1 + $0x4] ss:$0 sm:$0xff] (!%p227_p3)  ;;  %v1113_v1 = vld [vmem:[%s1668_s1 + $0x6] ss:$0 sm:$0xff] (!%p227_p3)  ;;  %s1295_s8 = smov (!%p227_p3), 1   ;;  %s1296_s17 = smov (!%p227_p3), 2  }
   0x9   : > { %s1683_s27 = smov (%p30_p4, %s1681_s27), 0  ;;  %230 = sbr.rel (%p227_p3) target bundleno = 652 (0x28c), region = 44 }
   0xa   : > { %339 = vrot.lane.b32.xlu0 (!%p227_p3), %v1111_v0, %s1295_s8  ;;  %343 = vrot.lane.b32.xlu1 (!%p227_p3), %v1113_v1, %s1295_s8  ;;  %v1112_v2 = vld [vmem:[%s1668_s1 + $0x5] ss:$0 sm:$0xff] (!%p227_p3)  ;;  %v1114_v3 = vld [vmem:[%s1668_s1 + $0x7] ss:$0 sm:$0xff] (!%p227_p3)  ;;  %p259_p5 = scmp.lt.s32.totalorder (!%p227_p3), %s1281_s22, 1  ;;  %s1102_s11 = sshll.u32 (!%p227_p3), %s1277_s21, 3 }
   0xb   : > { %v1119_v4 = vld [vmem:[%s1668_s1 + $0x8] ss:$0 sm:$0xff] (!%p227_p3)  ;;  %v1120_v5 = vld [vmem:[%s1668_s1 + $0x9] ss:$0 sm:$0xff] (!%p227_p3)  ;;  %v1121_v6 = vld [vmem:[%s1668_s1 + $0xa] ss:$0 sm:$0xff] (!%p227_p3) }
   0xc   : > { %v1122_v7 = vld [vmem:[%s1668_s1 + $0xb] ss:$0 sm:$0xff] (!%p227_p3)  ;;  %v1140_v8 = vld [vmem:[%s1668_s1 + $0x10] ss:$0 sm:$0xff] (!%p227_p3)  ;;  %v1141_v9 = vld [vmem:[%s1668_s1 + $0x11] ss:$0 sm:$0xff] (!%p227_p3) }
   0xd   : > { %v1142_v10 = vld [vmem:[%s1668_s1 + $0x12] ss:$0 sm:$0xff] (!%p227_p3)  ;;  %v1143_v11 = vld [vmem:[%s1668_s1 + $0x13] ss:$0 sm:$0xff] (!%p227_p3)  ;;  %v1148_v12 = vld [vmem:[%s1668_s1 + $0x14] ss:$0 sm:$0xff] (!%p227_p3) }
   0xe   : > { %341 = vrot.lane.b32.xlu0 (!%p227_p3), %v1112_v2, %s1295_s8  ;;  %345 = vrot.lane.b32.xlu1 (!%p227_p3), %v1114_v3, %s1295_s8  ;;  %v1149_v13 = vld [vmem:[%s1668_s1 + $0x15] ss:$0 sm:$0xff] (!%p227_p3)  ;;  %v1150_v14 = vld [vmem:[%s1668_s1 + $0x16] ss:$0 sm:$0xff] (!%p227_p3)  ;;  %s1298_s13 = smov (!%p227_p3), 126   ;;  %vm1304_vm0 = vmmov (!%p227_p3), 0  }
   0xf   : > { %v1151_v15 = vld [vmem:[%s1668_s1 + $0x17] ss:$0 sm:$0xff] (!%p227_p3)  ;;  %v1169_v16 = vld [vmem:[%s1668_s1 + $0x1c] ss:$0 sm:$0xff] (!%p227_p3)  ;;  %v1170_v17 = vld [vmem:[%s1668_s1 + $0x1d] ss:$0 sm:$0xff] (!%p227_p3) }
  0x10   : > { %v1171_v18 = vld [vmem:[%s1668_s1 + $0x1e] ss:$0 sm:$0xff]  ;;  %v1172_v19 = vld [vmem:[%s1668_s1 + $0x1f] ss:$0 sm:$0xff]  ;;  %v1177_v20 = vld [vmem:[%s1668_s1 + $0x20] ss:$0 sm:$0xff] }
  0x11   : > { %v1178_v21 = vld [vmem:[%s1668_s1 + $0x21] ss:$0 sm:$0xff]  ;;  %v1179_v22 = vld [vmem:[%s1668_s1 + $0x22] ss:$0 sm:$0xff]  ;;  %v1180_v23 = vld [vmem:[%s1668_s1 + $0x23] ss:$0 sm:$0xff] }
  0x12   : > { %400 = vrot.lane.b32.xlu0 %v1119_v4, %s1296_s17  ;;  %402 = vrot.lane.b32.xlu1 %v1120_v5, %s1296_s17  ;;  %s1685_s22 = smov (!%p259_p5, %s1281_s22), 1  ;;  %s1305_s14 = smov 64   ;;  %vm898_vm1 = vcmask 130048   ;;  %vm900_vm2 = vcmask 261120   ;;  %vm902_vm3 = vcmask 392192   ;;  %vm904_vm4 = vcmask 523264  }
  0x13   : > { %s1307_s15 = smov 48   ;;  %s1308_s16 = smov 96   ;;  %vm906_vm5 = vcmask 654336   ;;  %vm908_vm6 = vcmask 785408   ;;  %vm910_vm7 = vcmask 916480   ;;  %vm917_vm8 = vcmask 1043456  }
  0x14   : > { %s1309_s20 = smov 80   ;;  %s1310_s28 = smov 112   ;;  %vm913_vm9 = vcmask 31744  }
  0x15   : > { %p266_p6 = scmp.lt.s32.totalorder %s1277_s21, 1  ;;  %s1100_s9 = sshll.u32 %s1685_s22, 1 }
  0x16   : > { %404 = vrot.lane.b32.xlu0 %v1121_v6, %s1296_s17  ;;  %406 = vrot.lane.b32.xlu1 %v1122_v7, %s1296_s17 }
  0x17   : > { %s1687_s21 = smov (!%p266_p6, %s1277_s21), 1 }
  0x1a   : > { %504 = vrot.lane.b32.xlu0 %v1140_v8, %s1295_s8  ;;  %506 = vrot.lane.b32.xlu1 %v1141_v9, %s1295_s8 }
  0x1e   : > { %508 = vrot.lane.b32.xlu0 %v1142_v10, %s1295_s8  ;;  %510 = vrot.lane.b32.xlu1 %v1143_v11, %s1295_s8 }
  0x22   : > { %565 = vrot.lane.b32.xlu0 %v1148_v12, %s1296_s17  ;;  %567 = vrot.lane.b32.xlu1 %v1149_v13, %s1296_s17 }
  0x26   : > { %569 = vrot.lane.b32.xlu0 %v1150_v14, %s1296_s17  ;;  %571 = vrot.lane.b32.xlu1 %v1151_v15, %s1296_s17 }
  0x2a   : > { %669 = vrot.lane.b32.xlu0 %v1169_v16, %s1295_s8  ;;  %671 = vrot.lane.b32.xlu1 %v1170_v17, %s1295_s8 }
  0x2e   : > { %673 = vrot.lane.b32.xlu0 %v1171_v18, %s1295_s8  ;;  %675 = vrot.lane.b32.xlu1 %v1172_v19, %s1295_s8  ;;  %s1196_s8 = smul.u32 96, %s1685_s22 }
  0x30   : > { %s263_s10 = scalar_lea.vmem %s1667_s0, %s1196_s8 }
  0x31   : > { %s1485_s12 = scalar_lea.vmem %s263_s10, %s1102_s11  ;;  %s269_s10 = sadd.s32 %s1100_s9, %s1687_s21 }
  0x32   : > { %730 = vrot.lane.b32.xlu0 %v1177_v20, %s1296_s17  ;;  %732 = vrot.lane.b32.xlu1 %v1178_v21, %s1296_s17  ;;  %v1488_v24 = vld [vmem:[%s1485_s12] sm:$0xff]  ;;  %v1491_v27 = vld [vmem:[%s1485_s12 + $0x30] sm:$0xff]  ;;  %v1299_v20 = vmov 0.0   ;;  %s1101_s11 = sshll.u32 %s269_s10, 3 }
  0x33   : > { %v1495_v29 = vld [vmem:[%s1485_s12 + $0x18] sm:$0xff]  ;;  %v1500_v33 = vld [vmem:[%s1485_s12 + $0x48] sm:$0xff]  ;;  %1191 = vmatprep.subr.mxu0 %v1299_v20  ;;  %v1103_v21 = vld [vmem:[%s1668_s1] ss:$0 sm:$0xff]  ;;  %1193 = vmatprep.mubr.msk.f32.mxu0 %vm1304_vm0, %v1299_v20 }
  0x34   : > { %v1512_v43 = vld [vmem:[%s1485_s12 + $0x1] sm:$0xff]  ;;  %v1518_v47 = vld [vmem:[%s1485_s12 + $0x19] sm:$0xff]  ;;  %v1522_v49 = vld [vmem:[%s1485_s12 + $0x31] sm:$0xff] }
  0x35   : > { %v1528_v53 = vld [vmem:[%s1485_s12 + $0x49] sm:$0xff]  ;;  %v1546_v3 = vld [vmem:[%s1485_s12 + $0x1a] sm:$0xff]  ;;  %v1550_v5 = vld [vmem:[%s1485_s12 + $0x32] sm:$0xff] }
  0x36   : > { %734 = vrot.lane.b32.xlu0 %v1179_v22, %s1296_s17  ;;  %736 = vrot.lane.b32.xlu1 %v1180_v23, %s1296_s17  ;;  %s1297_s17 = smov 127   ;;  %v1540_v63 = vld [vmem:[%s1485_s12 + $0x2] sm:$0xff]  ;;  %v1556_v9 = vld [vmem:[%s1485_s12 + $0x4a] sm:$0xff]  ;;  %v306_v23 = vmul.f32 %v1103_v21, %v1488_v24 }
  0x7c   : > { %v340_v25 = vpop.permute.xlu0 %339  ;;  %v344_v26 = vpop.permute.xlu1 %343 }
  0x7d   : > { %v351_v28 = vmul.f32 %v340_v25, %v1488_v24  ;;  %v353_v30 = vmul.f32 %v344_v26, %v1491_v27  ;;  %v1104_v25 = vld [vmem:[%s1668_s1 + $0x1] ss:$0 sm:$0xff] }
  0x7f   : > { %359 = vrot.lane.b32.xlu0 %v351_v28, %s1297_s17  ;;  %v1105_v28 = vld [vmem:[%s1668_s1 + $0x2] ss:$0 sm:$0xff] }
  0x80   : > { %v342_v31 = vpop.permute.xlu0 %341  ;;  %v346_v32 = vpop.permute.xlu1 %345 }
  0x81   : > { %v352_v34 = vmul.f32 %v342_v31, %v1495_v29  ;;  %v354_v35 = vmul.f32 %v346_v32, %v1500_v33  ;;  %v1132_v31 = vld [vmem:[%s1668_s1 + $0xc] ss:$0 sm:$0xff] }
  0x83   : > { %361 = vrot.lane.b32.xlu1 %v352_v34, %s1297_s17  ;;  %363 = vrot.lane.b32.xlu0 %v353_v30, %s1297_s17  ;;  %v307_v34 = vmul.f32 %v1104_v25, %v1495_v29 }
  0x84   : > { %v401_v36 = vpop.permute.xlu0 %400  ;;  %v403_v37 = vpop.permute.xlu1 %402 }
  0x85   : > { %v412_v38 = vmul.f32 %v401_v36, %v1488_v24  ;;  %v413_v39 = vmul.f32 %v403_v37, %v1495_v29  ;;  %v1106_v24 = vld [vmem:[%s1668_s1 + $0x3] ss:$0 sm:$0xff]  ;;  %v471_v36 = vmul.f32 %v1132_v31, %v1512_v43  ;;  %v1133_v37 = vld [vmem:[%s1668_s1 + $0xd] ss:$0 sm:$0xff] }
  0x86   : > { %v309_v29 = vmul.f32 %v1106_v24, %v1500_v33 }
  0x87   : > { %365 = vrot.lane.b32.xlu1 %v354_v35, %s1297_s17  ;;  %420 = vrot.lane.b32.xlu0 %v412_v38, %s1298_s13  ;;  %v308_v35 = vmul.f32 %v1105_v28, %v1491_v27 }
  0x88   : > { %v405_v40 = vpop.permute.xlu0 %404  ;;  %v407_v41 = vpop.permute.xlu1 %406 }
  0x89   : > { %v414_v42 = vmul.f32 %v405_v40, %v1491_v27  ;;  %v415_v44 = vmul.f32 %v407_v41, %v1500_v33  ;;  %v1134_v40 = vld [vmem:[%s1668_s1 + $0xe] ss:$0 sm:$0xff]  ;;  %v472_v27 = vmul.f32 %v1133_v37, %v1518_v47  ;;  %v1300_v37 = vmov 1983009808  }
  0x8b   : > { %422 = vrot.lane.b32.xlu1 %v413_v39, %s1298_s13  ;;  %424 = vrot.lane.b32.xlu0 %v414_v42, %s1298_s13 }
  0x8c   : > { %v505_v45 = vpop.permute.xlu0 %504  ;;  %v507_v46 = vpop.permute.xlu1 %506 }
  0x8d   : > { %v516_v48 = vmul.f32 %v1512_v43, %v505_v45  ;;  %v517_v50 = vmul.f32 %v1518_v47, %v507_v46 }
  0x8f   : > { %426 = vrot.lane.b32.xlu1 %v415_v44, %s1298_s13  ;;  %524 = vrot.lane.b32.xlu0 %v516_v48, %s1297_s17 }
  0x90   : > { %v509_v51 = vpop.permute.xlu0 %508  ;;  %v511_v52 = vpop.permute.xlu1 %510 }
  0x91   : > { %v518_v54 = vmul.f32 %v1522_v49, %v509_v51  ;;  %v519_v55 = vmul.f32 %v1528_v53, %v511_v52 }
  0x93   : > { %526 = vrot.lane.b32.xlu1 %v517_v50, %s1297_s17  ;;  %528 = vrot.lane.b32.xlu0 %v518_v54, %s1297_s17  ;;  %v1135_v50 = vld [vmem:[%s1668_s1 + $0xf] ss:$0 sm:$0xff] }
  0x94   : > { %v566_v56 = vpop.permute.xlu0 %565  ;;  %v568_v57 = vpop.permute.xlu1 %567  ;;  %v474_v33 = vmul.f32 %v1135_v50, %v1528_v53 }
  0x95   : > { %v577_v58 = vmul.f32 %v1512_v43, %v566_v56  ;;  %v578_v59 = vmul.f32 %v1518_v47, %v568_v57  ;;  %v473_v43 = vmul.f32 %v1134_v40, %v1522_v49 }
  0x97   : > { %530 = vrot.lane.b32.xlu1 %v519_v55, %s1297_s17  ;;  %585 = vrot.lane.b32.xlu0 %v577_v58, %s1298_s13 }
  0x98   : > { %v570_v60 = vpop.permute.xlu0 %569  ;;  %v572_v61 = vpop.permute.xlu1 %571 }
  0x99   : > { %v579_v62 = vmul.f32 %v1522_v49, %v570_v60  ;;  %v580_v0 = vmul.f32 %v1528_v53, %v572_v61  ;;  %v1161_v49 = vld [vmem:[%s1668_s1 + $0x18] ss:$0 sm:$0xff]  ;;  %v1163_v53 = vld [vmem:[%s1668_s1 + $0x1a] ss:$0 sm:$0xff] }
  0x9b   : > { %587 = vrot.lane.b32.xlu1 %v578_v59, %s1298_s13  ;;  %589 = vrot.lane.b32.xlu0 %v579_v62, %s1298_s13 }
  0x9c   : > { %v670_v1 = vpop.permute.xlu0 %669  ;;  %v672_v2 = vpop.permute.xlu1 %671 }
  0x9d   : > { %v681_v4 = vmul.f32 %v1540_v63, %v670_v1  ;;  %v682_v6 = vmul.f32 %v1546_v3, %v672_v2  ;;  %v1162_v1 = vld [vmem:[%s1668_s1 + $0x19] ss:$0 sm:$0xff] }
  0x9f   : > { %591 = vrot.lane.b32.xlu1 %v580_v0, %s1298_s13  ;;  %689 = vrot.lane.b32.xlu0 %v681_v4, %s1297_s17  ;;  %v636_v0 = vmul.f32 %v1161_v49, %v1540_v63 }
  0xa0   : > { %v674_v7 = vpop.permute.xlu0 %673  ;;  %v676_v8 = vpop.permute.xlu1 %675 }
  0xa1   : > { %v683_v10 = vmul.f32 %v1550_v5, %v674_v7  ;;  %v684_v11 = vmul.f32 %v1556_v9, %v676_v8  ;;  %v637_v7 = vmul.f32 %v1162_v1, %v1546_v3 }
  0xa3   : > { %691 = vrot.lane.b32.xlu1 %v682_v6, %s1297_s17  ;;  %693 = vrot.lane.b32.xlu0 %v683_v10, %s1297_s17 }
  0xa4   : > { %v731_v12 = vpop.permute.xlu0 %730  ;;  %v733_v13 = vpop.permute.xlu1 %732 }
  0xa5   : > { %v742_v14 = vmul.f32 %v1540_v63, %v731_v12  ;;  %v743_v15 = vmul.f32 %v1546_v3, %v733_v13  ;;  %v638_v12 = vmul.f32 %v1163_v53, %v1550_v5 }
  0xa7   : > { %695 = vrot.lane.b32.xlu1 %v684_v11, %s1297_s17  ;;  %750 = vrot.lane.b32.xlu0 %v742_v14, %s1298_s13  ;;  %v1164_v14 = vld [vmem:[%s1668_s1 + $0x1b] ss:$0 sm:$0xff]  ;;  %s1302_s17 = smov 32  }
  0xa8   : > { %v735_v16 = vpop.permute.xlu0 %734  ;;  %v737_v17 = vpop.permute.xlu1 %736  ;;  %v639_v21 = vmul.f32 %v1164_v14, %v1556_v9 }
  0xa9   : > { %v744_v18 = vmul.f32 %v1550_v5, %v735_v16  ;;  %v745_v19 = vmul.f32 %v1556_v9, %v737_v17  ;;  %v1183_v9 = vld [vmem:[%s1669_s2 + $0x2] ss:$0 sm:$0xff] }
  0xab   : > { %752 = vrot.lane.b32.xlu1 %v743_v15, %s1298_s13  ;;  %754 = vrot.lane.b32.xlu0 %v744_v18, %s1298_s13 }
  0xaf   : > { %756 = vrot.lane.b32.xlu1 %v745_v19, %s1298_s13  ;;  %s1303_s13 = smov 16  }
  0xf1   : > { %v360_v22 = vpop.permute.xlu0 %359 }
  0xf2   : > { %v371_v32 = vadd.f32 %v360_v22, %v306_v23 }
  0xf5   : > { %v362_v26 = vpop.permute.xlu1 %361  ;;  %v364_v30 = vpop.permute.xlu0 %363 }
  0xf6   : > { %v372_v42 = vadd.f32 %v362_v26, %v307_v34  ;;  %v373_v44 = vadd.f32 %v364_v30, %v308_v35  ;;  %v1181_v34 = vld [vmem:[%s1669_s2] ss:$0 sm:$0xff] }
  0xf9   : > { %v366_v38 = vpop.permute.xlu1 %365  ;;  %v421_v39 = vpop.permute.xlu0 %420 }
  0xfa   : > { %v432_v41 = vadd.f32 %v421_v39, %v371_v32  ;;  %v374_v54 = vadd.f32 %v366_v38, %v309_v29  ;;  %v805_v38 = vunpack.c.l.s4 %v1300_v37  ;;  %v807_v39 = vlaneseq }
  0xfc   : > { %v475_v45 = vadd.f32 %v471_v36, %v432_v41 }
  0xfd   : > { %v423_v46 = vpop.permute.xlu1 %422  ;;  %v425_v48 = vpop.permute.xlu0 %424 }
  0xfe   : > { %v433_v51 = vadd.f32 %v423_v46, %v372_v42  ;;  %v434_v52 = vadd.f32 %v425_v48, %v373_v44  ;;  %v1182_v42 = vld [vmem:[%s1669_s2 + $0x1] ss:$0 sm:$0xff]  ;;  %v808_v46 = vshrl.u32 %v807_v39, 7  ;;  %v1184_v48 = vld [vmem:[%s1669_s2 + $0x3] ss:$0 sm:$0xff] }
 0x100   : > { %v476_v55 = vadd.f32 %v472_v27, %v433_v51  ;;  %v477_v56 = vadd.f32 %v473_v43, %v434_v52  ;;  %v806_v43 = vunpack.c.0.s8 %v805_v38  ;;  %v1301_v51 = vmov 1934713408  }
 0x101   : > { %v427_v57 = vpop.permute.xlu1 %426  ;;  %v525_v47 = vpop.permute.xlu0 %524  ;;  %v837_v52 = vunpack.c.l.s4 %v1301_v51 }
 0x102   : > { %v435_v58 = vadd.f32 %v427_v57, %v374_v54  ;;  %v536_v62 = vadd.f32 %v525_v47, %v475_v45 }
 0x104   : > { %v478_v59 = vadd.f32 %v474_v33, %v435_v58 }
 0x105   : > { %v527_v60 = vpop.permute.xlu1 %526  ;;  %v529_v61 = vpop.permute.xlu0 %528 }
 0x106   : > { %v537_v8 = vadd.f32 %v527_v60, %v476_v55  ;;  %v538_v10 = vadd.f32 %v529_v61, %v477_v56  ;;  %v809_v61 = vsub.s32 %v806_v43, %v808_v46 }
 0x109   : > { %v531_v2 = vpop.permute.xlu1 %530  ;;  %v586_v4 = vpop.permute.xlu0 %585 }
 0x10a   : > { %v597_v6 = vadd.f32 %v586_v4, %v536_v62  ;;  %v539_v17 = vadd.f32 %v531_v2, %v478_v59  ;;  %v838_v59 = vunpack.c.0.s8 %v837_v52 }
 0x10c   : > { %v640_v11 = vadd.f32 %v636_v0, %v597_v6  ;;  %v841_v1 = vsub.s32 %v838_v59, %v808_v46 }
 0x10d   : > { %v588_v13 = vpop.permute.xlu1 %587  ;;  %v590_v63 = vpop.permute.xlu0 %589 }
 0x10e   : > { %v598_v15 = vadd.f32 %v588_v13, %v537_v8  ;;  %v599_v16 = vadd.f32 %v590_v63, %v538_v10 }
 0x110   : > { %v641_v18 = vadd.f32 %v637_v7, %v598_v15  ;;  %v642_v19 = vadd.f32 %v638_v12, %v599_v16  ;;  %v1306_v16 = vmov 0  }
 0x111   : > { %v592_v22 = vpop.permute.xlu1 %591  ;;  %v690_v3 = vpop.permute.xlu0 %689  ;;  %1254 = vset.pattern.permute.xlu0 %v1306_v16  ;;  %1253 = vset.pattern.permute.xlu1 %v1306_v16 }
 0x112   : > { %v600_v23 = vadd.f32 %v592_v22, %v539_v17  ;;  %v701_v5 = vadd.f32 %v690_v3, %v640_v11  ;;  %v998_v22 = vld [vmem:[%s1672_s5] sm:$0xff] }
 0x114   : > { %v643_v25 = vadd.f32 %v639_v21, %v600_v23 }
 0x115   : > { %v692_v26 = vpop.permute.xlu1 %691  ;;  %v694_v28 = vpop.permute.xlu0 %693 }
 0x116   : > { %v702_v35 = vadd.f32 %v692_v26, %v641_v18  ;;  %v703_v24 = vadd.f32 %v694_v28, %v642_v19  ;;  %v991_v19 = vld [vmem:[%s1671_s4] sm:$0xff] }
 0x119   : > { %v696_v30 = vpop.permute.xlu1 %695  ;;  %v751_v31 = vpop.permute.xlu0 %750 }
 0x11a   : > { %v762_v32 = vadd.f32 %v751_v31, %v701_v5  ;;  %v704_v44 = vadd.f32 %v696_v30, %v643_v25 }
 0x11c   : > { %v794_v41 = vadd.f32 %v1181_v34, %v762_v32 }
 0x11d   : > { %v753_v36 = vpop.permute.xlu1 %752  ;;  %v755_v40 = vpop.permute.xlu0 %754 }
 0x11e   : > { %v763_v29 = vadd.f32 %v753_v36, %v702_v35  ;;  %v764_v27 = vadd.f32 %v755_v40, %v703_v24  ;;  %v798_v54 = vmax.f32 %v794_v41, 0.0  ;;  %v912_v36 = vld [vmem:[%s1670_s3] sm:$0xff] }
 0x120   : > { %v796_v45 = vadd.f32 %v1183_v9, %v764_v27  ;;  %v795_v55 = vadd.f32 %v1182_v42, %v763_v29 }
 0x121   : > { %v757_v50 = vpop.permute.xlu1 %756 }
 0x122   : > { %v800_v56 = vmax.f32 %v796_v45, 0.0  ;;  %v765_v33 = vadd.f32 %v757_v50, %v704_v44  ;;  %v799_v60 = vmax.f32 %v795_v55, 0.0 }
 0x124   : > { %v802_v57 = vcombine.low %v798_v54, %v800_v56  ;;  %v803_v47 = vcombine.high %v798_v54, %v800_v56  ;;  %v797_v58 = vadd.f32 %v1184_v48, %v765_v33 }
 0x126   : > { %v801_v49 = vmax.f32 %v797_v58, 0.0  ;;  %v810_v2 = vrot.slane %v802_v57, %v809_v61  ;;  %v817_v4 = vrot.slane %v803_v47, %v809_v61 }
 0x128   : > { %v818_v62 = vcombine.low %v799_v60, %v801_v49  ;;  %v819_v0 = vcombine.high %v799_v60, %v801_v49 }
 0x12a   : > { %v826_v53 = vrot.slane %v818_v62, %v809_v61  ;;  %v833_v6 = vrot.slane %v819_v0, %v809_v61 }
 0x12c   : > { %v835_v7 = vcombine.high %v810_v2, %v826_v53  ;;  %v834_v8 = vcombine.low %v810_v2, %v826_v53  ;;  %v850_v10 = vcombine.low %v817_v4, %v833_v6  ;;  %v851_v11 = vcombine.high %v817_v4, %v833_v6 }
 0x12e   : > { %v849_v12 = vrot.slane %v835_v7, %v841_v1  ;;  %v842_v13 = vrot.slane %v834_v8, %v841_v1  ;;  %v858_v14 = vrot.slane %v850_v10, %v841_v1  ;;  %v865_v17 = vrot.slane %v851_v11, %v841_v1 }
 0x130   : > { %875 = vrot.lane.b32.xlu1 %v849_v12, %s1302_s17  ;;  %v866_v63 = vcombine.high %v842_v13, %v1299_v20  ;;  %v867_v15 = vcombine.high %v849_v12, %v1299_v20  ;;  %v868_v18 = vcombine.high %v858_v14, %v1299_v20  ;;  %v869_v21 = vcombine.high %v865_v17, %v1299_v20 }
 0x132   : > { %871 = vrot.lane.b32.xlu0 %v866_v63, %s1303_s13  ;;  %s271_s13 = scalar_lea.vmem %s1673_s6, %s1101_s11 }
 0x134   : > { %883 = vrot.lane.b32.xlu1 %v858_v14, %s1305_s14 }
 0x136   : > { %879 = vrot.lane.b32.xlu0 %v867_v15, %s1307_s15 }
 0x138   : > { %891 = vrot.lane.b32.xlu1 %v865_v17, %s1308_s16 }
 0x13a   : > { %887 = vrot.lane.b32.xlu0 %v868_v18, %s1309_s20 }
 0x13c   : > { %994 = vperm.xlu1 %1253, %v991_v19  }
 0x13e   : > { %895 = vrot.lane.b32.xlu0 %v869_v21, %s1310_s28 }
 0x142   : > { %1001 = vperm.xlu0 %1254, %v998_v22  }
 0x1a2   : > { %v876_v3 = vpop.permute.xlu1 %875 }
 0x1a4   : > { %v872_v23 = vpop.permute.xlu0 %871 }
 0x1a5   : > { %v899_v25 = vsel %vm898_vm1, %v842_v13, %v872_v23 }
 0x1a6   : > { %v901_v26 = vsel %vm900_vm2, %v899_v25, %v876_v3  ;;  %v884_v5 = vpop.permute.xlu1 %883 }
 0x1a8   : > { %v880_v28 = vpop.permute.xlu0 %879 }
 0x1a9   : > { %v903_v30 = vsel %vm902_vm3, %v901_v26, %v880_v28 }
 0x1aa   : > { %v905_v20 = vsel %vm904_vm4, %v903_v30, %v884_v5  ;;  %v892_v34 = vpop.permute.xlu1 %891 }
 0x1ac   : > { %v888_v31 = vpop.permute.xlu0 %887 }
 0x1ad   : > { %v907_v32 = vsel %vm906_vm5, %v905_v20, %v888_v31 }
 0x1ae   : > { %v909_v24 = vsel %vm908_vm6, %v907_v32, %v892_v34 }
 0x1b0   : > { %v896_v35 = vpop.permute.xlu0 %895 }
 0x1b1   : > { %v911_v9 = vsel %vm910_vm7, %v909_v24, %v896_v35 }
 0x1b2   : > { %1192 = vmatpush3.msk.msra.mxu0 %vm917_vm8, %v911_v9 }
 0x1b3   : > { %1194 = vmatmul.mubr.msk.f32.vlgmr.msra.gmra.mrb[0].mxu0 %vm913_vm9, %v912_v36 }
 0x1bb   : > { %v995_v37 = vpop.permute.xlu1 %994 }
 0x1c1   : > { %v1002_v39 = vpop.permute.xlu0 %1001 }
 0x286   : > { %v987_v38 = vpop.f32.mrb[0].mxu0 }
 0x287   : > { %v997_v40 = vmul.f32 %v995_v37, %v987_v38  ;;  %v1195_v41 = vpop.f32.mrb[1].mxu0 }
 0x289   : > { %v1004_v29 = vadd.f32 %v1002_v39, %v997_v40 }
 0x28b   : > { %1005 = vst [vmem:[%s271_s13] sm:$0xff] %v1004_v29 }
 0x28c PF: > { %s16_s25 = sadd.s32 1, %s1293_s25   ;;  %s1674_s21 = smov %s1285_s23 }
 0x28d   : > { %p13_p7 = scmp.ge.s32.totalorder %s16_s25, 6   ;;  %s1675_s22 = smov %s1289_s24 }
 0x28e   : > { %s1676_s23 = smov %s1679_s26  ;;  %s1677_s24 = smov %s1683_s27 }
 0x28f   :  { %15 = sbr.rel (!%p13_p7) target bundleno = 3 (0x3), region = 85 }

</bundles_post_ra>
